<compile_context>
chip_gen: v7x
topology: tpu7x:2x2x1
jax: 0.10.0
libtpu: 0.0.40
codegen_flags: <defaults>
</compile_context>

<pallas_src>
import functools
import math

import jax
import jax.numpy as jnp
from jax.experimental import pallas as pl
from jax.experimental.pallas import tpu as pltpu


def _rmsnorm_kernel(x_ref, w_ref, o_ref, *, eps, inv_dim, x_dtype, exact_type_as):
    """One (tile_rows, dim) block: RMS-normalize along the lane axis."""
    x = x_ref[...].astype(jnp.float32)                 # x.float()
    # sum * (1/dim) with a Python-constant reciprocal instead of jnp.mean:
    # avoids a vector divide; the block's last dim is the true logical dim, so
    # the reduction never touches layout-padding lanes.
    mean_sq = jnp.sum(x * x, axis=-1, keepdims=True) * inv_dim
    inv_rms = jax.lax.rsqrt(mean_sq + eps)             # EUP rsqrt (free slot)
    normed = x * inv_rms
    if exact_type_as:
        # Match PyTorch `.type_as(x)` rounding exactly (extra cast on bf16 path).
        normed = normed.astype(x_dtype)
    # `output * self.weight` promotes to result_type(x, weight) == o_ref.dtype.
    o_ref[...] = normed.astype(o_ref.dtype) * w_ref[...].astype(o_ref.dtype)


def _tpu_generation_info():
    """Return (vmem_capacity_bytes, per-step IO traffic target in bytes)."""
    kind = ""
    try:
        kind = jax.devices()[0].device_kind.lower()
    except Exception:
        pass
    is_v7 = "v7" in kind
    vmem_cap = None
    try:
        vmem_cap = int(pltpu.get_tpu_info().vmem_capacity_bytes)
    except Exception:
        vmem_cap = None
    if not vmem_cap or vmem_cap <= 0:
        # Generation-aware fallback: v7x has 64 MiB/TC, v5e/v6e have 128 MiB.
        vmem_cap = (64 if is_v7 else 128) * 1024 * 1024
    # Per-step in+out bytes target: larger on v7x (~3.2 TB/s HBM) so the
    # ~0.35 us per-step overhead stays negligible.
    target_io = (12 if is_v7 else 6) * 1024 * 1024
    return vmem_cap, target_io


def rmsnorm(x, weight, eps=1e-6, *, tile_rows=None, out_dtype=None, exact_type_as=True):
    """RMSNorm over the last axis of x.

    x: (..., dim), weight: (dim,). By default the output dtype follows the
    PyTorch promotion rule of `normed.type_as(x) * weight`, i.e.
    result_type(x.dtype, weight.dtype). Pass out_dtype (e.g. x.dtype) to avoid
    promoting bf16 activations to f32 output (halves write traffic).
    Set exact_type_as=False to skip the f32->x.dtype->out_dtype double
    rounding (slightly different numerics than PyTorch, fewer casts on v7x).
    """
    orig_shape = x.shape
    dim = int(orig_shape[-1])
    rows = int(math.prod(orig_shape[:-1])) if len(orig_shape) > 1 else 1

    if out_dtype is None:
        out_dtype = jnp.result_type(x.dtype, weight.dtype)
    x_itemsize = jnp.dtype(x.dtype).itemsize
    out_itemsize = jnp.dtype(out_dtype).itemsize

    # Sublane packing: 8 rows/vreg for 32-bit, 16 for bf16, 32 for 8-bit dtypes.
    sublane = max(8, 32 // max(1, min(x_itemsize, out_itemsize)))

    vmem_cap, target_io = _tpu_generation_info()

    # VMEM footprint uses the hardware lane-padded dim (layout pads to 128);
    # HBM traffic uses the logical dim (DMA only moves the real columns).
    dim_hw = pl.cdiv(dim, 128) * 128
    # 2x double-buffered input + output blocks plus ~16 B/elem of f32
    # temporaries headroom (x_f32, x*x, normed, cast copies) for Mosaic.
    per_row_vmem = (2 * (x_itemsize + out_itemsize) + 16) * dim_hw
    per_row_io = (x_itemsize + out_itemsize) * dim

    if tile_rows is None:
        t_io = max(sublane, target_io // per_row_io)
        t_vmem = max(sublane, (vmem_cap // 2) // per_row_vmem)
        tile_rows = min(t_io, t_vmem)
        # Keep >= 8 grid steps when rows allow (>= 4 per v7x TensorCore) so the
        # next block's input DMA overlaps the current block's writeback — but
        # don't drop per-step traffic below ~2 MiB just to add steps.
        min_steps = 8
        if rows >= min_steps * sublane:
            steps_cap = rows // min_steps
            io_floor = max(sublane, (2 * 1024 * 1024) // per_row_io)
            tile_rows = min(tile_rows, max(steps_cap, min(io_floor, t_vmem)))
    tile_rows = max(sublane, (int(tile_rows) // sublane) * sublane)
    # Never exceed the sublane-rounded row count (avoids oversized VMEM blocks).
    tile_rows = min(tile_rows, max(sublane, pl.cdiv(rows, sublane) * sublane))

    grid = (pl.cdiv(rows, tile_rows),)

    # Leading-dim merge reshape: no data movement, no padding, no output crop.
    x2d = x.reshape(rows, dim)
    w2d = weight.reshape(1, dim)

    kernel = functools.partial(
        _rmsnorm_kernel,
        eps=float(eps),
        inv_dim=1.0 / float(dim),
        x_dtype=x.dtype,
        exact_type_as=exact_type_as,
    )

    # NOTE: for hot shapes with tiny hidden dims (dim << 128) one could pack
    # k = 128 // dim rows per lane-row and do a segmented in-kernel reduction
    # to make stores lane-dense; not done here since HBM traffic is already
    # exact (only the store slot is masked).
    # NOTE: if per-step IO cannot reach the target (few rows / huge dim),
    # pipeline_mode=pl.Buffered(3) on the I/O BlockSpecs is the next lever.
    out = pl.pallas_call(
        kernel,
        out_shape=jax.ShapeDtypeStruct((rows, dim), out_dtype),
        grid_spec=pltpu.PrefetchScalarGridSpec(
            num_scalar_prefetch=0,
            grid=grid,
            in_specs=[
                pl.BlockSpec((tile_rows, dim), lambda i: (i, 0)),
                pl.BlockSpec((1, dim), lambda i: (0, 0)),
            ],
            out_specs=pl.BlockSpec((tile_rows, dim), lambda i: (i, 0)),
        ),
        compiler_params=pltpu.CompilerParams(
            dimension_semantics=("parallel",),
            vmem_limit_bytes=int(vmem_cap * 0.75),
        ),
    )(x2d, w2d)

    return out.reshape(orig_shape)


def rmsnorm_reference(x, weight, eps=1e-6):
    xf = x.astype(jnp.float32)
    normed = xf * jax.lax.rsqrt(jnp.mean(xf * xf, axis=-1, keepdims=True) + eps)
    return normed.astype(x.dtype) * weight  # promotes like PyTorch `* self.weight`


if __name__ == "__main__":
    key = jax.random.PRNGKey(0)

    # Shapes implied by the module's forward: (batch, seq, hidden).
    batch, seq, hidden = 2, 8, 32
    x = jax.random.normal(key, (batch, seq, hidden), dtype=jnp.float32)
    weight = jnp.ones((hidden,), dtype=jnp.float32)  # nn.Parameter(torch.ones(dim))

    out = jax.block_until_ready(rmsnorm(x, weight, eps=1e-6))
    ref = rmsnorm_reference(x, weight, eps=1e-6)
    assert out.shape == x.shape and out.dtype == ref.dtype
    assert jnp.allclose(out, ref, atol=1e-5, rtol=1e-5)

    # Lane-dense hidden (multiple of 128) with ragged row count -> masked edge
    # block, no wrapper padding or cropping.
    k1, k2 = jax.random.split(key)
    x2 = jax.random.normal(k1, (3, 5, 256), dtype=jnp.float32)
    w2 = 1.0 + 0.1 * jax.random.normal(k2, (256,), dtype=jnp.float32)
    out2 = jax.block_until_ready(rmsnorm(x2, w2))
    ref2 = rmsnorm_reference(x2, w2)
    assert jnp.allclose(out2, ref2, atol=1e-5, rtol=1e-5)

    # bf16 activations with f32 weight: output promotes to f32 (PyTorch rule).
    x3 = jax.random.normal(k1, (4, 16, 256), dtype=jnp.bfloat16)
    out3 = jax.block_until_ready(rmsnorm(x3, w2))
    ref3 = rmsnorm_reference(x3, w2)
    assert out3.dtype == jnp.float32
    assert jnp.allclose(out3, ref3, atol=3e-2, rtol=3e-2)

    print("KERNEL_OK")
</pallas_src>

<mosaic_0001>
module attributes {stable_mosaic.version = 11 : i64} {
  func.func @_rmsnorm_kernel(%arg0: i32, %arg1: memref<16x32xf32, #tpu.memory_space<vmem>>, %arg2: memref<1x32xf32, #tpu.memory_space<vmem>>, %arg3: memref<16x32xf32, #tpu.memory_space<vmem>>) attributes {dimension_semantics = [#tpu.dimension_semantics<parallel>], iteration_bounds = array<i64: 1>, scalar_prefetch = 0 : i64, scratch_operands = 0 : i64, tpu.core_type = #tpu.core_type<tc>, window_params = [{transform_indices = @transform_0, window_bounds = array<i64: 16, 32>}, {pipeline_mode = #tpu.pipeline_mode<synchronous>, transform_indices = @transform_1, window_bounds = array<i64: 1, 32>}, {transform_indices = @transform_2, window_bounds = array<i64: 16, 32>}]} {
    %c0 = arith.constant 0 : index
    %c0_0 = arith.constant 0 : index
    %0 = vector.load %arg1[%c0, %c0_0] : memref<16x32xf32, #tpu.memory_space<vmem>>, vector<16x32xf32>
    %1 = arith.mulf %0, %0 : vector<16x32xf32>
    %cst = arith.constant dense<0.000000e+00> : vector<16xf32>
    %2 = vector.multi_reduction <add>, %1, %cst [1] : vector<16x32xf32> to vector<16xf32>
    %3 = vector.shape_cast %2 : vector<16xf32> to vector<16x1xf32>
    %cst_1 = arith.constant 3.125000e-02 : f32
    %4 = vector.broadcast %cst_1 : f32 to vector<16x1xf32>
    %5 = arith.mulf %3, %4 : vector<16x1xf32>
    %cst_2 = arith.constant 9.99999997E-7 : f32
    %6 = vector.broadcast %cst_2 : f32 to vector<16x1xf32>
    %7 = arith.addf %5, %6 : vector<16x1xf32>
    %8 = math.rsqrt %7 : vector<16x1xf32>
    %9 = vector.broadcast %8 : vector<16x1xf32> to vector<16x32xf32>
    %10 = arith.mulf %0, %9 : vector<16x32xf32>
    %c0_3 = arith.constant 0 : index
    %c0_4 = arith.constant 0 : index
    %11 = vector.load %arg2[%c0_3, %c0_4] : memref<1x32xf32, #tpu.memory_space<vmem>>, vector<1x32xf32>
    %12 = vector.broadcast %11 : vector<1x32xf32> to vector<16x32xf32>
    %13 = arith.mulf %10, %12 : vector<16x32xf32>
    %c0_5 = arith.constant 0 : index
    %c0_6 = arith.constant 0 : index
    %14 = vector.load %arg3[%c0_5, %c0_6] : memref<16x32xf32, #tpu.memory_space<vmem>>, vector<16x32xf32>
    tpu.vector_store %arg3[%c0_5, %c0_6], %13 {strides = array<i32>} : memref<16x32xf32, #tpu.memory_space<vmem>>, vector<16x32xf32>,
    return
  }
  func.func @transform_0(%arg0: i32) -> (i32, i32) {
    %c0_i32 = arith.constant 0 : i32
    %c0_i32_0 = arith.constant 0 : i32
    return %arg0, %c0_i32 : i32, i32
  }
  func.func @transform_1(%arg0: i32) -> (i32, i32) {
    %c0_i32 = arith.constant 0 : i32
    %c0_i32_0 = arith.constant 0 : i32
    %c0_i32_1 = arith.constant 0 : i32
    return %c0_i32, %c0_i32_0 : i32, i32
  }
  func.func @transform_2(%arg0: i32) -> (i32, i32) {
    %c0_i32 = arith.constant 0 : i32
    %c0_i32_0 = arith.constant 0 : i32
    return %arg0, %c0_i32 : i32, i32
  }
}

</mosaic_0001>

<bundles_post_ra>
// kernel: tpu_custom_call.1
= control target key start
LH: loop header
LB: loop body
LE: loop exit
PB: predicated region body
PF: predicated region fallthrough
CT: control target
= control target key end

     0   :  { %7 = vsyncpa [#allocation3], 0  ;;  %s234_s0 = inlined_call_operand.hbm [shape: f32[16,32], index: 0, kind: input, shape index: {}]   ;;  %s235_s1 = inlined_call_operand.hbm [shape: f32[1,32], index: 1, kind: input, shape index: {}]   ;;  %s236_s2 = inlined_call_operand.hbm [shape: f32[16,32], index: 2, kind: output, shape index: {}]  }
   0x1   :  { %8 = vsyncpa [#allocation6], 0 }
   0x2   :  { %9 = vsyncpa [#allocation4], 0  ;;  %s168_s9 = smov [#allocation2]   ;;  %s96_s13 = scalar_lea.hbm %s234_s0, 256 }
   0x3   :  { %s15_s10 = sshll.u32 %s168_s9, 4  ;;  %p97_p0 = scmp.ne.s32.totalorder %s234_s0, %s96_s13  ;;  %s16_s10 = int_to_ptr.vmem [resolvable:$true] %s15_s10 }
   0x4   :  { %p100_p1 = scmp.lt.u32.totalorder %s96_s13, %s234_s0 }
   0x6   :  { %p102_p2 = pnand %p100_p1, %p97_p0 }
   0x8   :  { %105 = shalt.err (!%p102_p2)
}
   0x9   :  { %s106_s18 = scalar_lea.vmem %s16_s10, 256  ;;  %p111_p4 = scmp.lt.s32.totalorder %s16_s10, %s16_s10 }
   0xa   :  { %p107_p3 = scmp.ne.s32.totalorder %s16_s10, %s106_s18  ;;  %p112_p5 = scmp.lt.s32.totalorder %s106_s18, %s106_s18 }
   0xc   :  { %p113_p6 = por %p112_p5, %p111_p4 }
   0xe   :  { %p114_p7 = pnand %p113_p6, %p107_p3 }
  0x10   :  { %117 = shalt.err (!%p114_p7)
}
  0x11   :  { %s169_s19 = smov 128   ;;  %s170_s20 = smov 8  }
  0x12   :  { %21 = dma.hbm_to_vmem [thread:$0]  %s234_s0, 256, %s16_s10, [#allocation3], %s169_s19, %s169_s19, %s170_s20  }
  0x13   :  { %s171_s23 = smov [#allocation5]   ;;  %s118_s27 = scalar_lea.hbm %s235_s1, 16 }
  0x14   :  { %s28_s24 = sshll.u32 %s171_s23, 4  ;;  %p119_p8 = scmp.ne.s32.totalorder %s235_s1, %s118_s27  ;;  %s29_s24 = int_to_ptr.vmem [resolvable:$true] %s28_s24 }
  0x15   :  { %p122_p9 = scmp.lt.u32.totalorder %s118_s27, %s235_s1 }
  0x17   :  { %p124_p10 = pnand %p122_p9, %p119_p8 }
  0x19   :  { %127 = shalt.err (!%p124_p10)
}
  0x1a   :  { %s128_s4 = scalar_lea.vmem %s29_s24, 16  ;;  %s132_s0 = scalar_lea.vmem %s29_s24, 32 }
  0x1b   :  { %p129_p11 = scmp.ne.s32.totalorder %s29_s24, %s128_s4  ;;  %p133_p12 = scmp.lt.s32.totalorder %s29_s24, %s29_s24 }
  0x1c   :  { %p134_p13 = scmp.lt.s32.totalorder %s132_s0, %s128_s4 }
  0x1e   :  { %p135_p0 = por %p134_p13, %p133_p12 }
  0x20   :  { %p136_p1 = pnand %p135_p0, %p129_p11 }
  0x22   :  { %139 = shalt.err (!%p136_p1)
}
  0x23   :  { %31 = dma.hbm_to_vmem [thread:$0]  %s235_s1, 16, %s29_s24, [#allocation6]  }
  0x24   :  { %162 = dma.done.wait [#allocation3], 256  }
  0x25   :  { %163 = vsyncadd [#allocation3], 4294967040 }
  0x26   :  { %164 = dma.done.wait [#allocation6], 16  }
  0x27   :  { %165 = vsyncadd [#allocation6], 4294967280  ;;  %v38_v0 = vld [vmem:[#allocation2] sm:$0xff]  ;;  %vm42_vm0 = vcmask 261120   ;;  %v39_v1 = vld [vmem:[#allocation2 + $0x8] sm:$0xff]  ;;  %s172_s1 = smov [#allocation7]  }
  0x28   :  { %v40_v2 = vmul.f32 %v38_v0, %v38_v0  ;;  %v41_v3 = vmul.f32 %v39_v1, %v39_v1  ;;  %v86_v13 = vld [vmem:[#allocation5] ss:$0 sm:$0xff]  ;;  %s73_s7 = sshll.u32 %s172_s1, 4  ;;  %s74_s7 = int_to_ptr.vmem [resolvable:$true] %s73_s7 }
  0x29   :  { %s140_s8 = scalar_lea.vmem %s74_s7, 256  ;;  %p145_p3 = scmp.lt.s32.totalorder %s74_s7, %s74_s7 }
  0x2a   :  { %v43_v4 = vsel %vm42_vm0, %v40_v2, 0.0  ;;  %v46_v5 = vsel %vm42_vm0, %v41_v3, 0.0  ;;  %p141_p2 = scmp.ne.s32.totalorder %s74_s7, %s140_s8  ;;  %p146_p4 = scmp.lt.s32.totalorder %s140_s8, %s140_s8 }
  0x2b   :  { %44 = vadd.xlane.f32.xlu0 %v43_v4 }
  0x2c   :  { %p147_p5 = por %p146_p4, %p145_p3 }
  0x2e   :  { %p148_p6 = pnand %p147_p5, %p141_p2 }
  0x2f   :  { %47 = vadd.xlane.f32.xlu0 %v46_v5 }
  0xb8   :  { %v45_v6 = vpop.xlane.xlu0 %44 }
  0xb9   :  { %v49_v7 = vmul.f32 0.03125, %v45_v6 }
  0xbb   :  { %v51_v8 = vadd.f32 1e-06, %v49_v7 }
  0xbc   :  { %v48_v9 = vpop.xlane.xlu0 %47 }
  0xbd   :  { %92 = vrsqrt.f32 %v51_v8  ;;  %v50_v10 = vmul.f32 0.03125, %v48_v9 }
  0xbf   :  { %v52_v11 = vadd.f32 1e-06, %v50_v10 }
  0xc1   :  { %94 = vrsqrt.f32 %v52_v11 }
  0xc7   :  { %v93_v12 = vpop.eup %92 }
  0xc8   :  { %v55_v14 = vmul.f32 %v93_v12, %v38_v0 }
  0xca   :  { %v64_v15 = vmul.f32 %v86_v13, %v55_v14 }
  0xcb   :  { %v95_v16 = vpop.eup %94 }
  0xcc   :  { %v56_v17 = vmul.f32 %v95_v16, %v39_v1  ;;  %66 = vst.msk [vmem:[#allocation7] sm:$0xff] %vm42_vm0, %v64_v15 }
  0xce   :  { %v65_v18 = vmul.f32 %v86_v13, %v56_v17 }
  0xd0   :  { %67 = vst.msk [vmem:[#allocation7 + $0x8] sm:$0xff] %vm42_vm0, %v65_v18 }
  0xd1   :  { %151 = shalt.err (!%p148_p6)
}
  0xd2   :  { %s152_s11 = scalar_lea.hbm %s236_s2, 256 }
  0xd3   :  { %p153_p7 = scmp.ne.s32.totalorder %s236_s2, %s152_s11  ;;  %p156_p8 = scmp.lt.u32.totalorder %s152_s11, %s236_s2 }
  0xd5   :  { %p158_p9 = pnand %p156_p8, %p153_p7 }
  0xd7   :  { %161 = shalt.err (!%p158_p9)
}
  0xd8   :  { %79 = dma.vmem_to_hbm [thread:$0]  %s74_s7, 256, %s236_s2, [#allocation4], %s169_s19, %s169_s19, %s170_s20  }
  0xd9   :  { %166 = dma.done.wait [#allocation4], 256  }
  0xda   :  { %167 = vsyncadd [#allocation4], 4294967040 }
  0xdb   :  { %83 = vsyncpa [#allocation3], 1 }
  0xdc   :  { %84 = vsyncpa [#allocation6], 1 }
  0xdd   :  { %85 = vsyncpa [#allocation4], 1 }

</bundles_post_ra>
